<compile_context>
chip_gen: v7x
topology: tpu7x:2x2x1
jax: 0.10.0
libtpu: 0.0.40
codegen_flags: <defaults>
</compile_context>

<pallas_src>
import jax
import jax.numpy as jnp
from jax.experimental import pallas as pl
from jax.experimental.pallas import tpu as pltpu

LANES = 128          # lane-dense width of padded logits / packed output
_NEG_PAD = -1e30     # bias for padded logit lanes (finite: exp() underflows to 0, no NaNs)


def actor_kernel(x_ref, g_ref, w1_ref, b1_ref, w2_ref, b2_ref, w3_ref, b3_ref,
                 out_ref):
    mm_dtype = w1_ref.dtype   # matmul operand dtype (bf16 by default)

    # fc1 -> ReLU   (low-precision operands, f32 accumulation; elementwise in f32)
    h1 = jnp.dot(x_ref[...], w1_ref[...],
                 preferred_element_type=jnp.float32) + b1_ref[...]
    h1 = jnp.maximum(h1, 0.0)

    # fc2 -> ReLU
    h2 = jnp.dot(h1.astype(mm_dtype), w2_ref[...],
                 preferred_element_type=jnp.float32) + b2_ref[...]
    h2 = jnp.maximum(h2, 0.0)

    # fc3 -> logits, already padded to 128 lanes (lanes >= A carry a ~-1e30 bias).
    logits = jnp.dot(h2.astype(mm_dtype), w3_ref[...],
                     preferred_element_type=jnp.float32) + b3_ref[...]

    TB, L = logits.shape

    # Numerically stable log-softmax at full lane width; padded lanes contribute
    # exp(-huge) == 0 to every reduction so results match the A-lane softmax.
    m = jnp.max(logits, axis=-1, keepdims=True)
    sh = logits - m
    e = jnp.exp(sh)
    z = jnp.sum(e, axis=-1, keepdims=True)
    log_z = jnp.log(z)
    log_probs = sh - log_z
    # Entropy without materializing probs: H = log z - sum(e*sh)/z.
    # (Plain division keeps the kernel portable to the interpret harness; the
    #  kernel is launch/DMA bound so the EUP-reciprocal saving is negligible.)
    ent = log_z - jnp.sum(e * sh, axis=-1, keepdims=True) / z

    # Categorical(probs).sample() via Gumbel-max, at full 128-lane width.
    perturbed = log_probs + g_ref[...]
    pmax = jnp.max(perturbed, axis=-1, keepdims=True)
    lane = jax.lax.broadcasted_iota(jnp.int32, (TB, L), 1)
    action = jnp.min(jnp.where(perturbed >= pmax, lane, L), axis=-1, keepdims=True)

    # dist.log_prob(action) = log_probs[action]  (one-hot gather, full width)
    lp = jnp.sum(jnp.where(lane == action, log_probs, 0.0), axis=-1, keepdims=True)

    # Packed lane-dense output: lane0 = action (as float, exact for small ints),
    # lane1 = log_prob, lane2 = entropy.  Single unmasked 128-lane store.
    act_f = action.astype(jnp.float32)
    packed = jnp.where(lane == 0, act_f,
             jnp.where(lane == 1, lp,
             jnp.where(lane == 2, ent, 0.0)))
    out_ref[...] = packed


def _choose_tb(B):
    # Prefer the largest batch tile that still leaves >= 2 grid steps, so both
    # v7x TensorCores get tiles; otherwise fall back to one whole-batch tile.
    for tb in (1024, 512, 256, 128, 64, 32, 16, 8):
        if B % tb == 0 and B // tb >= 2:
            return tb
    return B


def actor_forward(x, w1, b1, w2, b2, w3, b3, key, *, tb=None,
                  matmul_dtype=jnp.bfloat16):
    """Fused Actor forward.

    Returns (action int32 (B,), log_prob f32 (B,), entropy f32 (B,)).
    """
    B, S = x.shape
    A = w3.shape[1]
    assert A <= LANES, "action_size must fit in one 128-lane vreg"

    if tb is None:
        tb = _choose_tb(B)
    assert B % tb == 0, "batch must be divisible by the batch tile"
    grid = (B // tb,)

    # Wrapper-side dtype prep (one-time): low-precision matmul operands, f32 biases.
    x_mm = x.astype(matmul_dtype)
    w1_mm = w1.astype(matmul_dtype)
    w2_mm = w2.astype(matmul_dtype)
    b1_f = b1.reshape(1, -1).astype(jnp.float32)
    b2_f = b2.reshape(1, -1).astype(jnp.float32)
    # Pad fc3 to a full 128-lane output: zero weights + very negative bias in
    # lanes >= A so the softmax/argmax tail runs unmasked at full lane width.
    w3_mm = jnp.zeros((w3.shape[0], LANES), matmul_dtype).at[:, :A].set(
        w3.astype(matmul_dtype))
    b3_f = jnp.full((1, LANES), _NEG_PAD, jnp.float32).at[:, :A].set(
        b3.reshape(1, -1).astype(jnp.float32))

    # Lane-dense Gumbel noise, generated wrapper-side (portable; reproducible
    # independently of the batch-tile size).
    g = jax.random.gumbel(key, (B, LANES), jnp.float32)

    def rep2d(arr):  # weights/biases replicated (resident) across batch tiles
        return pl.BlockSpec(arr.shape, lambda i: (0, 0))

    out = pl.pallas_call(
        actor_kernel,
        out_shape=jax.ShapeDtypeStruct((B, LANES), jnp.float32),
        grid_spec=pltpu.PrefetchScalarGridSpec(
            num_scalar_prefetch=0,
            grid=grid,
            in_specs=[
                pl.BlockSpec((tb, S), lambda i: (i, 0)),       # x tile
                pl.BlockSpec((tb, LANES), lambda i: (i, 0)),   # gumbel tile
                rep2d(w1_mm), rep2d(b1_f),
                rep2d(w2_mm), rep2d(b2_f),
                rep2d(w3_mm), rep2d(b3_f),
            ],
            out_specs=pl.BlockSpec((tb, LANES), lambda i: (i, 0)),
        ),
        compiler_params=pltpu.CompilerParams(
            dimension_semantics=("parallel",)),   # megacore split on v7x
    )(x_mm, g, w1_mm, b1_f, w2_mm, b2_f, w3_mm, b3_f)

    action = out[:, 0].astype(jnp.int32)
    log_prob = out[:, 1]
    entropy = out[:, 2]
    return action, log_prob, entropy


def make_params(key, state_size, action_size, hidden_0=256, hidden_1=128):
    """Orthogonal weights / zero biases (matches initialize_fc_layer)."""
    k1, k2, k3 = jax.random.split(key, 3)
    ortho = jax.nn.initializers.orthogonal(scale=1.0)
    w1 = ortho(k1, (state_size, hidden_0), jnp.float32)
    b1 = jnp.zeros((1, hidden_0), jnp.float32)
    w2 = ortho(k2, (hidden_0, hidden_1), jnp.float32)
    b2 = jnp.zeros((1, hidden_1), jnp.float32)
    w3 = ortho(k3, (hidden_1, action_size), jnp.float32)
    b3 = jnp.zeros((1, action_size), jnp.float32)
    return w1, b1, w2, b2, w3, b3


def actor_distribution_ref(x, w1, b1, w2, b2, w3, b3, matmul_dtype=jnp.bfloat16):
    """Pure-JAX reference for the deterministic part of the distribution,
    mirroring the kernel's low-precision-operand / f32-accumulation matmuls."""
    dot = lambda a, b: jnp.dot(a.astype(matmul_dtype), b.astype(matmul_dtype),
                               preferred_element_type=jnp.float32)
    h1 = jax.nn.relu(dot(x, w1) + b1)
    h2 = jax.nn.relu(dot(h1, w2) + b2)
    logits = dot(h2, w3) + b3
    log_probs = jax.nn.log_softmax(logits, axis=1)
    probs = jnp.exp(log_probs)
    ent = -jnp.sum(probs * log_probs, axis=1)
    return log_probs, ent


if __name__ == "__main__":
    B = 64           # small batch; splits into 2 tiles of 32 -> exercises the grid
    STATE = 32       # state_size
    ACTION = 8       # action_size
    H0, H1 = 256, 128  # module defaults

    key = jax.random.PRNGKey(0)
    k_param, k_x, k_noise = jax.random.split(key, 3)

    params = make_params(k_param, STATE, ACTION, H0, H1)
    x = jax.random.normal(k_x, (B, STATE), jnp.float32)

    action, log_prob, entropy = actor_forward(x, *params, key=k_noise)
    jax.block_until_ready((action, log_prob, entropy))

    # Correctness: validate the deterministic parts of the distribution against
    # a pure-JAX reference (sampling uses Gumbel-max with wrapper-side noise).
    log_probs_ref, ent_ref = actor_distribution_ref(x, *params)
    assert bool(jnp.all((action >= 0) & (action < ACTION))), "action out of range"
    lp_ref = jnp.take_along_axis(log_probs_ref, action[:, None], axis=1)[:, 0]
    assert bool(jnp.allclose(log_prob, lp_ref, atol=2e-3, rtol=2e-3)), "log_prob mismatch"
    assert bool(jnp.allclose(entropy, ent_ref, atol=2e-3, rtol=2e-3)), "entropy mismatch"

    print("KERNEL_OK")
</pallas_src>

<mosaic_0001>
module attributes {stable_mosaic.version = 11 : i64} {
  func.func @actor_kernel(%arg0: i32, %arg1: memref<32x32xbf16, #tpu.memory_space<vmem>>, %arg2: memref<32x128xf32, #tpu.memory_space<vmem>>, %arg3: memref<32x256xbf16, #tpu.memory_space<vmem>>, %arg4: memref<1x256xf32, #tpu.memory_space<vmem>>, %arg5: memref<256x128xbf16, #tpu.memory_space<vmem>>, %arg6: memref<1x128xf32, #tpu.memory_space<vmem>>, %arg7: memref<128x128xbf16, #tpu.memory_space<vmem>>, %arg8: memref<1x128xf32, #tpu.memory_space<vmem>>, %arg9: memref<32x128xf32, #tpu.memory_space<vmem>>) attributes {dimension_semantics = [#tpu.dimension_semantics<parallel>], iteration_bounds = array<i64: 2>, scalar_prefetch = 0 : i64, scratch_operands = 0 : i64, tpu.core_type = #tpu.core_type<tc>, window_params = [{transform_indices = @transform_0, window_bounds = array<i64: 32, 32>}, {transform_indices = @transform_1, window_bounds = array<i64: 32, 128>}, {pipeline_mode = #tpu.pipeline_mode<synchronous>, transform_indices = @transform_2, window_bounds = array<i64: 32, 256>}, {pipeline_mode = #tpu.pipeline_mode<synchronous>, transform_indices = @transform_3, window_bounds = array<i64: 1, 256>}, {pipeline_mode = #tpu.pipeline_mode<synchronous>, transform_indices = @transform_4, window_bounds = array<i64: 256, 128>}, {pipeline_mode = #tpu.pipeline_mode<synchronous>, transform_indices = @transform_5, window_bounds = array<i64: 1, 128>}, {pipeline_mode = #tpu.pipeline_mode<synchronous>, transform_indices = @transform_6, window_bounds = array<i64: 128, 128>}, {pipeline_mode = #tpu.pipeline_mode<synchronous>, transform_indices = @transform_7, window_bounds = array<i64: 1, 128>}, {transform_indices = @transform_8, window_bounds = array<i64: 32, 128>}]} {
    %c0 = arith.constant 0 : index
    %c0_0 = arith.constant 0 : index
    %0 = vector.load %arg1[%c0, %c0_0] : memref<32x32xbf16, #tpu.memory_space<vmem>>, vector<32x32xbf16>
    %c0_1 = arith.constant 0 : index
    %c0_2 = arith.constant 0 : index
    %1 = vector.load %arg3[%c0_1, %c0_2] : memref<32x256xbf16, #tpu.memory_space<vmem>>, vector<32x256xbf16>
    %cst = arith.constant dense<0.000000e+00> : vector<32x256xf32>
    %2 = tpu.matmul %0, %1, %cst {dimension_numbers = #tpu.dot_dimension_numbers<[1], [0], [0], [1], [0, 0, 1, 1], [], []>} : vector<32x32xbf16>, vector<32x256xbf16>, vector<32x256xf32> -> vector<32x256xf32>
    %c0_3 = arith.constant 0 : index
    %c0_4 = arith.constant 0 : index
    %3 = vector.load %arg4[%c0_3, %c0_4] : memref<1x256xf32, #tpu.memory_space<vmem>>, vector<1x256xf32>
    %4 = vector.broadcast %3 : vector<1x256xf32> to vector<32x256xf32>
    %5 = arith.addf %2, %4 : vector<32x256xf32>
    %cst_5 = arith.constant 0.000000e+00 : f32
    %6 = vector.broadcast %cst_5 : f32 to vector<32x256xf32>
    %7 = arith.maximumf %5, %6 : vector<32x256xf32>
    %8 = arith.truncf %7 : vector<32x256xf32> to vector<32x256xbf16>
    %c0_6 = arith.constant 0 : index
    %c0_7 = arith.constant 0 : index
    %9 = vector.load %arg5[%c0_6, %c0_7] : memref<256x128xbf16, #tpu.memory_space<vmem>>, vector<256x128xbf16>
    %cst_8 = arith.constant dense<0.000000e+00> : vector<32x128xf32>
    %10 = tpu.matmul %8, %9, %cst_8 {dimension_numbers = #tpu.dot_dimension_numbers<[1], [0], [0], [1], [0, 0, 1, 1], [], []>} : vector<32x256xbf16>, vector<256x128xbf16>, vector<32x128xf32> -> vector<32x128xf32>
    %c0_9 = arith.constant 0 : index
    %c0_10 = arith.constant 0 : index
    %11 = vector.load %arg6[%c0_9, %c0_10] : memref<1x128xf32, #tpu.memory_space<vmem>>, vector<1x128xf32>
    %12 = vector.broadcast %11 : vector<1x128xf32> to vector<32x128xf32>
    %13 = arith.addf %10, %12 : vector<32x128xf32>
    %cst_11 = arith.constant 0.000000e+00 : f32
    %14 = vector.broadcast %cst_11 : f32 to vector<32x128xf32>
    %15 = arith.maximumf %13, %14 : vector<32x128xf32>
    %16 = arith.truncf %15 : vector<32x128xf32> to vector<32x128xbf16>
    %c0_12 = arith.constant 0 : index
    %c0_13 = arith.constant 0 : index
    %17 = vector.load %arg7[%c0_12, %c0_13] : memref<128x128xbf16, #tpu.memory_space<vmem>>, vector<128x128xbf16>
    %cst_14 = arith.constant dense<0.000000e+00> : vector<32x128xf32>
    %18 = tpu.matmul %16, %17, %cst_14 {dimension_numbers = #tpu.dot_dimension_numbers<[1], [0], [0], [1], [0, 0, 1, 1], [], []>} : vector<32x128xbf16>, vector<128x128xbf16>, vector<32x128xf32> -> vector<32x128xf32>
    %c0_15 = arith.constant 0 : index
    %c0_16 = arith.constant 0 : index
    %19 = vector.load %arg8[%c0_15, %c0_16] : memref<1x128xf32, #tpu.memory_space<vmem>>, vector<1x128xf32>
    %20 = vector.broadcast %19 : vector<1x128xf32> to vector<32x128xf32>
    %21 = arith.addf %18, %20 : vector<32x128xf32>
    %cst_17 = arith.constant dense<0xFF800000> : vector<32xf32>
    %22 = vector.multi_reduction <maximumf>, %21, %cst_17 [1] : vector<32x128xf32> to vector<32xf32>
    %23 = vector.shape_cast %22 : vector<32xf32> to vector<32x1xf32>
    %24 = vector.broadcast %23 : vector<32x1xf32> to vector<32x128xf32>
    %25 = arith.subf %21, %24 : vector<32x128xf32>
    %26 = math.exp %25 : vector<32x128xf32>
    %cst_18 = arith.constant dense<0.000000e+00> : vector<32xf32>
    %27 = vector.multi_reduction <add>, %26, %cst_18 [1] : vector<32x128xf32> to vector<32xf32>
    %28 = vector.shape_cast %27 : vector<32xf32> to vector<32x1xf32>
    %29 = math.log %28 : vector<32x1xf32>
    %30 = vector.broadcast %29 : vector<32x1xf32> to vector<32x128xf32>
    %31 = arith.subf %25, %30 : vector<32x128xf32>
    %32 = arith.mulf %26, %25 : vector<32x128xf32>
    %cst_19 = arith.constant dense<0.000000e+00> : vector<32xf32>
    %33 = vector.multi_reduction <add>, %32, %cst_19 [1] : vector<32x128xf32> to vector<32xf32>
    %34 = vector.shape_cast %33 : vector<32xf32> to vector<32x1xf32>
    %35 = arith.divf %34, %28 : vector<32x1xf32>
    %36 = arith.subf %29, %35 : vector<32x1xf32>
    %c0_20 = arith.constant 0 : index
    %c0_21 = arith.constant 0 : index
    %37 = vector.load %arg2[%c0_20, %c0_21] : memref<32x128xf32, #tpu.memory_space<vmem>>, vector<32x128xf32>
    %38 = arith.addf %31, %37 : vector<32x128xf32>
    %cst_22 = arith.constant dense<0xFF800000> : vector<32xf32>
    %39 = vector.multi_reduction <maximumf>, %38, %cst_22 [1] : vector<32x128xf32> to vector<32xf32>
    %40 = vector.shape_cast %39 : vector<32xf32> to vector<32x1xf32>
    %41 = tpu.iota {dimensions = array<i32: 1>} : vector<32x128xi32>
    %42 = vector.broadcast %40 : vector<32x1xf32> to vector<32x128xf32>
    %43 = arith.cmpf oge, %38, %42 : vector<32x128xf32>
    %c128_i32 = arith.constant 128 : i32
    %44 = vector.broadcast %c128_i32 : i32 to vector<32x128xi32>
    %45 = arith.select %43, %41, %44 : vector<32x128xi1>, vector<32x128xi32>
    %cst_23 = arith.constant dense<2147483647> : vector<32xi32>
    %46 = vector.multi_reduction <minsi>, %45, %cst_23 [1] : vector<32x128xi32> to vector<32xi32>
    %47 = vector.shape_cast %46 : vector<32xi32> to vector<32x1xi32>
    %48 = vector.broadcast %47 : vector<32x1xi32> to vector<32x128xi32>
    %49 = arith.cmpi eq, %41, %48 : vector<32x128xi32>
    %cst_24 = arith.constant 0.000000e+00 : f32
    %50 = vector.broadcast %cst_24 : f32 to vector<32x128xf32>
    %51 = arith.select %49, %31, %50 : vector<32x128xi1>, vector<32x128xf32>
    %cst_25 = arith.constant dense<0.000000e+00> : vector<32xf32>
    %52 = vector.multi_reduction <add>, %51, %cst_25 [1] : vector<32x128xf32> to vector<32xf32>
    %53 = vector.shape_cast %52 : vector<32xf32> to vector<32x1xf32>
    %54 = arith.sitofp %47 : vector<32x1xi32> to vector<32x1xf32>
    %c0_i32 = arith.constant 0 : i32
    %55 = vector.broadcast %c0_i32 : i32 to vector<32x128xi32>
    %56 = arith.cmpi eq, %41, %55 : vector<32x128xi32>
    %c1_i32 = arith.constant 1 : i32
    %57 = vector.broadcast %c1_i32 : i32 to vector<32x128xi32>
    %58 = arith.cmpi eq, %41, %57 : vector<32x128xi32>
    %c2_i32 = arith.constant 2 : i32
    %59 = vector.broadcast %c2_i32 : i32 to vector<32x128xi32>
    %60 = arith.cmpi eq, %41, %59 : vector<32x128xi32>
    %cst_26 = arith.constant 0.000000e+00 : f32
    %61 = vector.shape_cast %36 : vector<32x1xf32> to vector<32x1xf32>
    %62 = vector.broadcast %61 : vector<32x1xf32> to vector<32x128xf32>
    %63 = vector.broadcast %cst_26 : f32 to vector<32x128xf32>
    %64 = arith.select %60, %62, %63 : vector<32x128xi1>, vector<32x128xf32>
    %65 = vector.shape_cast %53 : vector<32x1xf32> to vector<32x1xf32>
    %66 = vector.broadcast %65 : vector<32x1xf32> to vector<32x128xf32>
    %67 = arith.select %58, %66, %64 : vector<32x128xi1>, vector<32x128xf32>
    %68 = vector.shape_cast %54 : vector<32x1xf32> to vector<32x1xf32>
    %69 = vector.broadcast %68 : vector<32x1xf32> to vector<32x128xf32>
    %70 = arith.select %56, %69, %67 : vector<32x128xi1>, vector<32x128xf32>
    %c0_27 = arith.constant 0 : index
    %c0_28 = arith.constant 0 : index
    %71 = vector.load %arg9[%c0_27, %c0_28] : memref<32x128xf32, #tpu.memory_space<vmem>>, vector<32x128xf32>
    tpu.vector_store %arg9[%c0_27, %c0_28], %70 {strides = array<i32>} : memref<32x128xf32, #tpu.memory_space<vmem>>, vector<32x128xf32>,
    return
  }
  func.func @transform_0(%arg0: i32) -> (i32, i32) {
    %c0_i32 = arith.constant 0 : i32
    %c0_i32_0 = arith.constant 0 : i32
    return %arg0, %c0_i32 : i32, i32
  }
  func.func @transform_1(%arg0: i32) -> (i32, i32) {
    %c0_i32 = arith.constant 0 : i32
    %c0_i32_0 = arith.constant 0 : i32
    return %arg0, %c0_i32 : i32, i32
  }
  func.func @transform_2(%arg0: i32) -> (i32, i32) {
    %c0_i32 = arith.constant 0 : i32
    %c0_i32_0 = arith.constant 0 : i32
    %c0_i32_1 = arith.constant 0 : i32
    return %c0_i32, %c0_i32_0 : i32, i32
  }
  func.func @transform_3(%arg0: i32) -> (i32, i32) {
    %c0_i32 = arith.constant 0 : i32
    %c0_i32_0 = arith.constant 0 : i32
    %c0_i32_1 = arith.constant 0 : i32
    return %c0_i32, %c0_i32_0 : i32, i32
  }
  func.func @transform_4(%arg0: i32) -> (i32, i32) {
    %c0_i32 = arith.constant 0 : i32
    %c0_i32_0 = arith.constant 0 : i32
    %c0_i32_1 = arith.constant 0 : i32
    return %c0_i32, %c0_i32_0 : i32, i32
  }
  func.func @transform_5(%arg0: i32) -> (i32, i32) {
    %c0_i32 = arith.constant 0 : i32
    %c0_i32_0 = arith.constant 0 : i32
    %c0_i32_1 = arith.constant 0 : i32
    return %c0_i32, %c0_i32_0 : i32, i32
  }
  func.func @transform_6(%arg0: i32) -> (i32, i32) {
    %c0_i32 = arith.constant 0 : i32
    %c0_i32_0 = arith.constant 0 : i32
    %c0_i32_1 = arith.constant 0 : i32
    return %c0_i32, %c0_i32_0 : i32, i32
  }
  func.func @transform_7(%arg0: i32) -> (i32, i32) {
    %c0_i32 = arith.constant 0 : i32
    %c0_i32_0 = arith.constant 0 : i32
    %c0_i32_1 = arith.constant 0 : i32
    return %c0_i32, %c0_i32_0 : i32, i32
  }
  func.func @transform_8(%arg0: i32) -> (i32, i32) {
    %c0_i32 = arith.constant 0 : i32
    %c0_i32_0 = arith.constant 0 : i32
    return %arg0, %c0_i32 : i32, i32
  }
}

</mosaic_0001>

<bundles_post_ra>
// kernel: tpu_custom_call.1
= control target key start
LH: loop header
LB: loop body
LE: loop exit
PB: predicated region body
PF: predicated region fallthrough
CT: control target
= control target key end

     0   :  { %13 = vsyncpa [#allocation3], 0  ;;  %s1983_s0 = inlined_call_operand.vmem [shape: bf16[64,32], index: 0, kind: input, shape index: {}]   ;;  %s1984_s1 = inlined_call_operand.hbm [shape: f32[64,128], index: 1, kind: input, shape index: {}]   ;;  %s1985_s2 = inlined_call_operand.hbm [shape: bf16[32,256], index: 2, kind: input, shape index: {}]   ;;  %s1986_s3 = inlined_call_operand.vmem [shape: f32[1,256], index: 3, kind: input, shape index: {}]   ;;  %s1987_s4 = inlined_call_operand.hbm [shape: bf16[256,128], index: 4, kind: input, shape index: {}]   ;;  %s1988_s5 = inlined_call_operand.vmem [shape: f32[1,128], index: 5, kind: input, shape index: {}]   ;;  %s1989_s6 = inlined_call_operand.vmem [shape: bf16[128,128], index: 6, kind: input, shape index: {}]   ;;  %s1990_s7 = inlined_call_operand.vmem [shape: f32[1,128], index: 7, kind: input, shape index: {}]   ;;  %s1991_s8 = inlined_call_operand.hbm [shape: f32[64,128], index: 8, kind: output, shape index: {}]  }
   0x1   :  { %15 = vsyncpa [#allocation3 + $0x1], 0 }
   0x2   :  { %16 = vsyncpa [#allocation6], 0 }
   0x3   :  { %17 = vsyncpa [#allocation4], 0 }
   0x4   :  { %19 = vsyncpa [#allocation4 + $0x1], 0  ;;  %s1571_s27 = smov 0   ;;  %s1573_s28 = smov 0  }
   0x5   :  { %s1575_s29 = smov 0   ;;  %s1577_s30 = smov 0  }
   0x6 LB: > { %s1592_s9 = sadd.s32 4294967295, %s1513_s30   ;;  %s1113_s10 = sadd.s32 4294967294, %s1513_s30   ;;  %s1513_s30 = sphi %s1577_s30, %s2015_s30   ;;  %s1509_s29 = sphi %s1575_s29, %s2014_s29   ;;  %s1505_s28 = sphi %s1573_s28, %s2013_s28   ;;  %s1501_s27 = sphi %s1571_s27, %s2012_s27  }
   0x7   : > { %p71_p0 = scmp.ne.s32.totalorder %s1505_s28, %s1501_s27  ;;  %p1992_p1 = scmp.eq.s32.totalorder %s1592_s9, 0 }
   0x8   : > { %p227_p3 = scmp.eq.s32.totalorder %s1113_s10, 1  ;;  %p1114_p5 = scmp.ge.s32.totalorder %s1513_s30, 1 }
   0x9   : > { %p1601_p4 = por %p1992_p1, %p71_p0  ;;  %p234_p7 = scmp.lt.s32.totalorder %s1513_s30, 3 }
   0xa   : > { %p1606_p6 = por %p227_p3, %p71_p0  ;;  %s1515_s14 = smov [#allocation5]  }
   0xb   : > { %s1997_s11 = scalar_select %p1601_p4, 1, 0 }
   0xc   : > { %s1998_s12 = scalar_select %p1606_p6, 1, 0 }
   0xd   : > { %p1611_p8 = pnand %p1114_p5, %p234_p7  ;;  %s246_s15 = sshll.u32 %s1515_s14, 4  ;;  %s1615_s15 = int_to_ptr.vmem [resolvable:$true] %s246_s15 }
   0xe   : > { %s1516_s17 = smov [#allocation7]   ;;  %s1357_s21 = scalar_lea.hbm %s1985_s2, 512 }
   0xf   : > { %p1239_p9 = pneg %p1611_p8  ;;  %s262_s18 = sshll.u32 %s1516_s17, 4  ;;  %s1626_s18 = int_to_ptr.vmem [resolvable:$true] %s262_s18 }
  0x10   : > { %p1358_p12 = scmp.ne.s32.totalorder %s1985_s2, %s1357_s21  ;;  %p1364_p5 = scmp.lt.u32.totalorder %s1357_s21, %s1985_s2 }
  0x11   : > { %p1622_p11 = pnand %p1239_p9, %p1992_p1 }
  0x13   : > { %p1359_p13 = pneg %p1622_p11 }
  0x15   : > { %p1360_p0 = pnand %p1359_p13, %p1358_p12 }
  0x17   : > { %p1361_p3 = pneg %p1360_p0 }
  0x19   : > { %p1366_p7 = pnand %p1364_p5, %p1361_p3 }
  0x1b   : > { %1369 = shalt.err (!%p1366_p7)
}
  0x1c   : > { %s1370_s26 = scalar_lea.vmem %s1615_s15, 512  ;;  %p1378_p2 = scmp.lt.s32.totalorder %s1615_s15, %s1615_s15 }
  0x1d   : > { %p1371_p9 = scmp.ne.s32.totalorder %s1615_s15, %s1370_s26  ;;  %p1379_p12 = scmp.lt.s32.totalorder %s1370_s26, %s1370_s26 }
  0x1f   : > { %p1373_p10 = pnand %p1371_p9, %p1359_p13  ;;  %p1380_p0 = por %p1379_p12, %p1378_p2 }
  0x21   : > { %p1374_p1 = pneg %p1373_p10 }
  0x23   : > { %p1381_p6 = pnand %p1380_p0, %p1374_p1 }
  0x25   : > { %1384 = shalt.err (!%p1381_p6)
}
  0x26   : > { %s1993_s10 = smov 128   ;;  %s1994_s14 = smov 8  }
  0x27   : > { %1242 = dma.hbm_to_vmem [thread:$0]  (!%p1622_p11), %s1985_s2, 512, %s1615_s15, [#allocation6], %s1993_s10, %s1993_s10, %s1994_s14  }
  0x28   : > { %s1385_s22 = scalar_lea.hbm %s1987_s4, 2048 }
  0x29   : > { %p1386_p1 = scmp.ne.s32.totalorder %s1987_s4, %s1385_s22  ;;  %p1392_p10 = scmp.lt.u32.totalorder %s1385_s22, %s1987_s4 }
  0x2b   : > { %p1388_p2 = pnand %p1386_p1, %p1359_p13 }
  0x2d   : > { %p1389_p6 = pneg %p1388_p2 }
  0x2f   : > { %p1394_p3 = pnand %p1392_p10, %p1389_p6 }
  0x31   : > { %1397 = shalt.err (!%p1394_p3)
}
  0x32   : > { %s1398_s15 = scalar_lea.vmem %s1626_s18, 2048  ;;  %p1406_p12 = scmp.lt.s32.totalorder %s1626_s18, %s1626_s18 }
  0x33   : > { %p1399_p5 = scmp.ne.s32.totalorder %s1626_s18, %s1398_s15  ;;  %p1407_p0 = scmp.lt.s32.totalorder %s1398_s15, %s1398_s15 }
  0x35   : > { %p1401_p7 = pnand %p1399_p5, %p1359_p13  ;;  %p1408_p1 = por %p1407_p0, %p1406_p12 }
  0x37   : > { %p1402_p9 = pneg %p1401_p7 }
  0x39   : > { %p1409_p2 = pnand %p1408_p1, %p1402_p9 }
  0x3b   : > { %1412 = shalt.err (!%p1409_p2)
}
  0x3c   : > { %s1519_s17 = smov 64   ;;  %s1520_s19 = smov 4  }
  0x3d   : > { %1245 = dma.hbm_to_vmem [thread:$0]  (!%p1622_p11), %s1987_s4, 2048, %s1626_s18, [#allocation6], %s1519_s17, %s1519_s17, %s1520_s19  }
  0x3e   : > { %s1684_s22 = sadd.s32 1, %s1513_s30   ;;  %s58_s24 = sadd.s32 1, %s1509_s29 }
  0x3f   : > { %s55_s23 = ssub.s32 %s1513_s30, %s1684_s22  ;;  %p65_p6 = scmp.ne.s32.totalorder %s1509_s29, %s1505_s28 }
  0x40   : > { %p56_p13 = scmp.eq.s32.totalorder %s55_s23, 0  ;;  %p66_p10 = scmp.eq.s32.totalorder %s1513_s30, 0 }
  0x41   : > { %p2001_p5 = scmp.eq.s32.totalorder %s1592_s9, 1  ;;  %p1256_p9 = scmp.lt.s32.totalorder %s1513_s30, 2 }
  0x42   : > { %s1693_s25 = scalar_select %p56_p13, %s1509_s29, %s58_s24  }
  0x43   : > { %p67_p3 = por %p66_p10, %p65_p6  ;;  %p1697_p7 = por %p2001_p5, %p65_p6 }
  0x44   : > { %s294_s16 = sand.u32 1, %s1509_s29   ;;  %s1167_s18 = sshll.u32 %s1513_s30, 9 }
  0x45   : > { %s2002_s26 = scalar_select %p1697_p7, 1, 0 }
  0x46   : > { %s1118_s15 = sshll.u32 %s294_s16, 5  ;;  %s1707_s20 = scalar_lea.hbm %s1984_s1, %s1167_s18 }
  0x47   : > { %s298_s21 = scalar_lea.vmem [#allocation2], %s1118_s15  ;;  %p1711_p11 = pnand %p1256_p9, %p67_p3 }
  0x48   : > { %s305_s23 = sshll.u32 %s298_s21, 4  ;;  %s1715_s10 = scalar_lea.sflag [#allocation3], %s294_s16  ;;  %s1709_s23 = int_to_ptr.vmem [resolvable:$true] %s305_s23 }
  0x49   : > { %s1413_s14 = scalar_lea.hbm %s1707_s20, 512  ;;  %p1415_p0 = pneg %p1711_p11 }
  0x4a   : > { %p1414_p12 = scmp.ne.s32.totalorder %s1707_s20, %s1413_s14  ;;  %s1418_s17 = scalar_lea.hbm %s1984_s1, 1024 }
  0x4b   : > { %p1419_p13 = scmp.lt.u32.totalorder %s1707_s20, %s1984_s1  ;;  %p1420_p6 = scmp.lt.u32.totalorder %s1418_s17, %s1413_s14 }
  0x4c   : > { %p1416_p1 = pnand %p1415_p0, %p1414_p12  ;;  %p1422_p3 = scmp.lt.u32.totalorder %s1413_s14, %s1707_s20 }
  0x4d   : > { %p1421_p10 = por %p1420_p6, %p1419_p13 }
  0x4e   : > { %p1417_p2 = pneg %p1416_p1 }
  0x4f   : > { %p1423_p5 = por %p1422_p3, %p1421_p10 }
  0x51   : > { %p1424_p9 = pnand %p1423_p5, %p1417_p2 }
  0x53   : > { %1427 = shalt.err (!%p1424_p9)
}
  0x54   : > { %s1428_s16 = scalar_lea.vmem %s1709_s23, 512  ;;  %s1521_s15 = smov [#allocation2]  }
  0x55   : > { %p1429_p12 = scmp.ne.s32.totalorder %s1709_s23, %s1428_s16  ;;  %s1433_s18 = sshll.u32 %s1521_s15, 4  ;;  %s1434_s18 = int_to_ptr.vmem [resolvable:$false] %s1433_s18 }
  0x56   : > { %s1435_s19 = scalar_lea.vmem %s1434_s18, 1024  ;;  %p1436_p4 = scmp.lt.s32.totalorder %s1709_s23, %s1434_s18 }
  0x57   : > { %p1431_p1 = pnand %p1429_p12, %p1415_p0  ;;  %p1437_p13 = scmp.lt.s32.totalorder %s1435_s19, %s1428_s16 }
  0x59   : > { %p1432_p7 = pneg %p1431_p1  ;;  %p1438_p6 = por %p1437_p13, %p1436_p4 }
  0x5b   : > { %p1439_p10 = pnand %p1438_p6, %p1432_p7 }
  0x5d   : > { %1442 = shalt.err (!%p1439_p10)
}
  0x5e   : > { %s2004_s14 = smov 8   ;;  %s2005_s17 = smov 128  }
  0x5f   : > { %1249 = dma.hbm_to_vmem [thread:$0]  (!%p1711_p11), %s1707_s20, 512, %s1709_s23, %s1715_s10, %s2005_s17, %s2005_s17, %s2004_s14  }
  0x60   : > { %317 = sbr.rel (%p1611_p8) target bundleno = 1707 (0x6ab), region = 52  ;;  %s1749_s21 = sand.u32 (!%p1611_p8), 1, %s1505_s28  }
  0x61   : > { %s1122_s16 = sshll.u32 (!%p1611_p8), %s1749_s21, 5  ;;  %s320_s15 = scalar_lea.sflag (!%p1611_p8), [#allocation3], %s1749_s21 }
  0x62   : > { %s1755_s24 = scalar_lea.vmem (!%p1611_p8), [#allocation2], %s1122_s16  ;;  %p2006_p4 = scmp.ne.s32.totalorder (!%p1611_p8), %s1997_s11, 0 }
  0x67   : > { %1488 = dma.done.wait (%p2006_p4), %s320_s15, 512  }
  0x68   : > { %1490 = vsyncadd (%p2006_p4), %s320_s15, 4294966784  ;;  %p2007_p7 = scmp.eq.s32.totalorder %s1592_s9, 0 }
  0x6a   : > { %1492 = dma.done.wait (%p2007_p7), [#allocation6], 2560   ;;  %p2008_p8 = pmov %p2007_p7 }
  0x6b   : > { %s1126_s13 = sshll.u32 %s1592_s9, 2  ;;  %v1522_v0 = vmov 0   ;;  %v1301_v1 = vld [vmem:[#allocation5 + $0x4] ss:$8 sps:$4 sm:$0xff]   ;;  %v1303_v2 = vld [vmem:[#allocation5] ss:$8 sps:$4 sm:$0xff]   ;;  %v388_v26 = vlaneseq }
  0x6c   : > { %1494 = vsyncadd (%p2008_p8), [#allocation6], 4294964736  ;;  %467 = vmatprep.mubr.bf16.mxu0 %v1522_v0  ;;  %p370_p11 = scmp.lt.s32.totalorder %s1126_s13, 7  ;;  %435 = vmatprep.subr.bf16.mxu0 %v1301_v1  ;;  %v1304_v3 = vld [vmem:[#allocation5 + $0x14] ss:$8 sps:$4 sm:$0xff]   ;;  %v1309_v6 = vld [vmem:[#allocation7 + $0x40] sm:$0xff]  }
  0x6d   : > { %436 = vmatpush1.bf16.msra.mxu0 %v1303_v2  ;;  %v1306_v4 = vld [vmem:[#allocation5 + $0x10] ss:$8 sps:$4 sm:$0xff]   ;;  %v1310_v7 = vld [vmem:[#allocation7] sm:$0xff]   ;;  %vm428_vm0 = vcmask 261120   ;;  %1169 = vmatprep.subr.bf16.mxu1 %v1309_v6  ;;  %v1311_v8 = vld [vmem:[#allocation7 + $0x48] sm:$0xff]   ;;  %v389_v27 = vshrl.u32 %v388_v26, 7 }
  0x6e   : > { %s2017_s13 = smov (!%p370_p11, %s1126_s13), 7  ;;  %437 = vmatprep.subr.bf16.mxu0 %v1304_v3  ;;  %1170 = vmatpush3.bf16.msra.mxu1 %v1310_v7  ;;  %v1312_v9 = vld [vmem:[#allocation7 + $0x8] sm:$0xff]   ;;  %v1313_v10 = vld [vmem:[#allocation7 + $0x50] sm:$0xff]   ;;  %v1315_v12 = vld [vmem:[#allocation7 + $0x58] sm:$0xff]   ;;  %s1168_s17 = sshll.u32 %s1592_s9, 9 }
  0x6f   : > { %s1127_s10 = sshll.u32 %s2017_s13, 2  ;;  %1171 = vmatprep.subr.bf16.mxu1 %v1311_v8  ;;  %v1314_v11 = vld [vmem:[#allocation7 + $0x10] sm:$0xff]   ;;  %v1316_v14 = vld [vmem:[#allocation7 + $0x18] sm:$0xff]   ;;  %v1317_v15 = vld [vmem:[#allocation7 + $0x60] sm:$0xff]   ;;  %v390_v28 = vsub.s32 0, %v389_v27  ;;  %v394_v30 = vsub.s32 1, %v389_v27  ;;  %s1935_s15 = scalar_lea.hbm %s1991_s8, %s1168_s17 }
  0x70   : > { %s373_s11 = scalar_lea.vmem %s1983_s0, %s1127_s10  ;;  %v1318_v16 = vld [vmem:[#allocation7 + $0x20] sm:$0xff]   ;;  %v1319_v17 = vld [vmem:[#allocation7 + $0x68] sm:$0xff]   ;;  %v1321_v19 = vld [vmem:[#allocation7 + $0x70] sm:$0xff]   ;;  %s996_s13 = scalar_lea.sflag [#allocation4], %s1749_s21 }
  0x71   : > { %v1307_v5 = vld [vmem:[%s373_s11] sm:$0xff]   ;;  %438 = vmatpush1.bf16.msra.mxu0 %v1306_v4  ;;  %v1308_v13 = vld [vmem:[%s373_s11 + $0x8] sm:$0xff]   ;;  %v1322_v20 = vld [vmem:[#allocation7 + $0x30] sm:$0xff]   ;;  %p2009_p2 = scmp.ne.s32.totalorder %s2002_s26, 0  ;;  %s1523_s20 = smov [#allocation8]  }
  0x72   : > { %1172 = vmatpush3.bf16.msra.mxu1 %v1312_v9  ;;  %v1320_v18 = vld [vmem:[#allocation7 + $0x28] sm:$0xff]   ;;  %v1323_v21 = vld [vmem:[#allocation7 + $0x78] sm:$0xff]   ;;  %v1325_v23 = vld [vmem:[%s1989_s6] sm:$0xff]   ;;  %s1447_s23 = sshll.u32 %s1523_s20, 4  ;;  %s1448_s23 = int_to_ptr.vmem [resolvable:$false] %s1447_s23 }
  0x73   : > { %1173 = vmatprep.subr.bf16.mxu1 %v1313_v10  ;;  %v1324_v22 = vld [vmem:[#allocation7 + $0x38] sm:$0xff]   ;;  %v1326_v24 = vld [vmem:[%s1989_s6 + $0x8] sm:$0xff]   ;;  %1207 = vmatprep.subr.bf16.mxu0 %v1325_v23  ;;  %v1327_v25 = vld [vmem:[%s1989_s6 + $0x10] sm:$0xff]   ;;  %s1449_s11 = scalar_lea.vmem %s1448_s23, 1024 }
  0x74   : > { %1134 = vmatmul.mubr.msk.bf16.vlgmr.msra.gmra.mrb[0].mxu0 %vm428_vm0, %v1307_v5  ;;  %v386_v29 = vld [vmem:[%s1986_s3] sm:$0x3]  ;;  %v1328_v61 = vld [vmem:[%s1989_s6 + $0x18] sm:$0xff]   ;;  %v1330_v63 = vld [vmem:[%s1989_s6 + $0x28] sm:$0xff]  }
  0x75   : > { %477 = vmatprep.mubr.bf16.mxu0 %v1522_v0  ;;  %1208 = vmatpush3.bf16.msra.mxu0 %v1325_v23  ;;  %v391_v31 = vrot.slane %v386_v29, %v390_v28  ;;  %v395_v32 = vrot.slane %v386_v29, %v394_v30  ;;  %v1329_v62 = vld [vmem:[%s1989_s6 + $0x20] sm:$0xff]   ;;  %v1331_v0 = vld [vmem:[%s1989_s6 + $0x30] sm:$0xff]   ;;  %v1332_v1 = vld [vmem:[%s1989_s6 + $0x38] sm:$0xff]  }
  0x76   : > { %1174 = vmatpush3.bf16.msra.mxu1 %v1314_v11  ;;  %1209 = vmatprep.subr.bf16.mxu0 %v1326_v24  ;;  %v1136_v3 = vld [vmem:[%s1988_s5] ss:$0 sm:$0xff] }
  0x77   : > { %1175 = vmatprep.subr.bf16.mxu1 %v1315_v12 }
  0x79   : > { %1210 = vmatpush3.bf16.msra.mxu0 %v1326_v24 }
  0x7a   : > { %1176 = vmatpush3.bf16.msra.mxu1 %v1316_v14  ;;  %1211 = vmatprep.subr.bf16.mxu0 %v1327_v25 }
  0x7b   : > { %1177 = vmatprep.subr.bf16.mxu1 %v1317_v15 }
  0x7c   : > { %1135 = vmatmul.mubr.msk.bf16.gmra.mrb[4].mxu0 %vm428_vm0, %v1308_v13 }
  0x7d   : > { %1212 = vmatpush3.bf16.msra.mxu0 %v1327_v25  ;;  %v1153_v25 = vld [vmem:[%s1990_s7] ss:$0 sm:$0xff] }
  0x7e   : > { %1178 = vmatpush3.bf16.msra.mxu1 %v1318_v16  ;;  %1213 = vmatprep.subr.bf16.mxu0 %v1328_v61 }
  0x7f   : > { %1179 = vmatprep.subr.bf16.mxu1 %v1319_v17 }
  0x81   : > { %1214 = vmatpush3.bf16.msra.mxu0 %v1328_v61 }
  0x82   : > { %1180 = vmatpush3.bf16.msra.mxu1 %v1320_v18  ;;  %1215 = vmatprep.subr.bf16.mxu0 %v1329_v62 }
  0x83   : > { %1181 = vmatprep.subr.bf16.mxu1 %v1321_v19 }
  0x85   : > { %1216 = vmatpush3.bf16.msra.mxu0 %v1329_v62 }
  0x86   : > { %1182 = vmatpush3.bf16.msra.mxu1 %v1322_v20  ;;  %1217 = vmatprep.subr.bf16.mxu0 %v1330_v63 }
  0x87   : > { %1183 = vmatprep.subr.bf16.mxu1 %v1323_v21 }
  0x89   : > { %1218 = vmatpush3.bf16.msra.mxu0 %v1330_v63  ;;  %v875_v63 = vld [vmem:[%s1755_s24 + $0x8] sm:$0xff] }
  0x8a   : > { %1184 = vmatpush3.bf16.msra.mxu1 %v1324_v22  ;;  %1219 = vmatprep.subr.bf16.mxu0 %v1331_v0 }
  0x8d   : > { %1220 = vmatpush3.bf16.msra.mxu0 %v1331_v0 }
  0x8e   : > { %1221 = vmatprep.subr.bf16.mxu0 %v1332_v1 }
  0x91   : > { %1222 = vmatpush3.bf16.msra.mxu0 %v1332_v1 }
 0x147   : > { %v469_v33 = vpop.f32.mrb[0].mxu0 }
 0x148   : > { %v470_v34 = vadd.f32 %v469_v33, %v391_v31  ;;  %v471_v35 = vpop.f32.mrb[1].mxu0 }
 0x149   : > { %v472_v36 = vadd.f32 %v471_v35, %v395_v32  ;;  %v473_v37 = vpop.f32.mrb[2].mxu0 }
 0x14a   : > { %v474_v38 = vadd.f32 %v473_v37, %v391_v31  ;;  %v475_v39 = vpop.f32.mrb[3].mxu0  ;;  %v488_v41 = vmax.f32 %v470_v34, 0.0 }
 0x14b   : > { %v476_v40 = vadd.f32 %v475_v39, %v395_v32  ;;  %v489_v43 = vmax.f32 %v472_v36, 0.0 }
 0x14c   : > { %v490_v42 = vmax.f32 %v474_v38, 0.0 }
 0x14d   : > { %v491_v44 = vmax.f32 %v476_v40, 0.0 }
 0x14e   : > { %v496_v45 = vpack.c.bf16 %v490_v42, %v488_v41 }
 0x14f   : > { %v479_v46 = vpop.f32.mrb[4].mxu0  ;;  %v497_v47 = vpack.c.bf16 %v491_v44, %v489_v43 }
 0x150   : > { %v480_v48 = vadd.f32 %v479_v46, %v391_v31  ;;  %v481_v49 = vpop.f32.mrb[5].mxu0 }
 0x151   : > { %v482_v50 = vadd.f32 %v481_v49, %v395_v32  ;;  %v483_v51 = vpop.f32.mrb[6].mxu0  ;;  %667 = vmatprep.mubr.bf16.mxu1 %v497_v47 }
 0x152   : > { %v484_v52 = vadd.f32 %v483_v51, %v391_v31  ;;  %v485_v53 = vpop.f32.mrb[7].mxu0  ;;  %668 = vmatmul.mubr.bf16.vlgmr.msra.gmra.mrb[0].mxu1 %v496_v45  ;;  %v492_v55 = vmax.f32 %v480_v48, 0.0 }
 0x153   : > { %v486_v54 = vadd.f32 %v485_v53, %v395_v32  ;;  %v493_v57 = vmax.f32 %v482_v50, 0.0 }
 0x154   : > { %v494_v56 = vmax.f32 %v484_v52, 0.0 }
 0x155   : > { %v495_v58 = vmax.f32 %v486_v54, 0.0 }
 0x156   : > { %v498_v59 = vpack.c.bf16 %v494_v56, %v492_v55 }
 0x157   : > { %v499_v60 = vpack.c.bf16 %v495_v58, %v493_v57  ;;  %v874_v57 = vld [vmem:[%s1755_s24] sm:$0xff] }
 0x159   : > { %675 = vmatprep.mubr.bf16.mxu1 %v499_v60 }
 0x15a   : > { %676 = vmatmul.mubr.bf16.gmra.mrb[4].mxu1 %v498_v59 }
 0x225   : > { %v1185_v2 = vpop.f32.mrb[0].mxu1 }
 0x226   : > { %v1186_v4 = vpop.f32.mrb[1].mxu1 }
 0x227   : > { %v1187_v5 = vadd.f32 %v1186_v4, %v1185_v2  ;;  %v1188_v6 = vpop.f32.mrb[2].mxu1 }
 0x228   : > { %v1189_v7 = vpop.f32.mrb[3].mxu1 }
 0x229   : > { %v670_v8 = vadd.f32 %v1187_v5, %v1136_v3  ;;  %v1190_v9 = vadd.f32 %v1189_v7, %v1188_v6  ;;  %v877_v7 = vld [vmem:[%s1755_s24 + $0x18] sm:$0xff] }
 0x22b   : > { %v673_v10 = vadd.f32 %v1190_v9, %v1136_v3  ;;  %v684_v11 = vmax.f32 %v670_v8, 0.0 }
 0x22d   : > { %v685_v12 = vmax.f32 %v673_v10, 0.0  ;;  %v1191_v13 = vpop.f32.mrb[4].mxu1 }
 0x22e   : > { %v1192_v14 = vpop.f32.mrb[5].mxu1 }
 0x22f   : > { %v1193_v15 = vadd.f32 %v1192_v14, %v1191_v13  ;;  %v1194_v16 = vpop.f32.mrb[6].mxu1  ;;  %v688_v17 = vpack.c.bf16 %v685_v12, %v684_v11  ;;  %v1874_v11 = vand.u32 127, %v388_v26 }
 0x230   : > { %v1195_v18 = vpop.f32.mrb[7].mxu1 }
 0x231   : > { %v678_v19 = vadd.f32 %v1193_v15, %v1136_v3  ;;  %v1196_v20 = vadd.f32 %v1195_v18, %v1194_v16  ;;  %1223 = vmatprep.mubr.bf16.mxu0 %v688_v17  ;;  %vm978_vm13 = vcmp.eq.s32.totalorder %v1874_v11, 2  ;;  %vm977_vm14 = vcmp.eq.s32.totalorder %v1874_v11, 1 }
 0x232   : > { %vm976_vm15 = vcmp.eq.s32.totalorder %v1874_v11, 0 }
 0x233   : > { %v681_v21 = vadd.f32 %v1196_v20, %v1136_v3  ;;  %v686_v22 = vmax.f32 %v678_v19, 0.0  ;;  %v876_v3 = vld [vmem:[%s1755_s24 + $0x10] sm:$0xff]  ;;  %s368_s24 = scalar_lea.vmem [#allocation8], %s1122_s16 }
 0x234   : > { %s1009_s14 = sshll.u32 %s368_s24, 4  ;;  %s1924_s14 = int_to_ptr.vmem [resolvable:$true] %s1009_s14 }
 0x235   : > { %v687_v23 = vmax.f32 %v681_v21, 0.0  ;;  %s1443_s10 = scalar_lea.vmem %s1924_s14, 512  ;;  %p1450_p9 = scmp.lt.s32.totalorder %s1924_s14, %s1448_s23 }
 0x236   : > { %p1444_p0 = scmp.ne.s32.totalorder %s1924_s14, %s1443_s10  ;;  %p1451_p12 = scmp.lt.s32.totalorder %s1449_s11, %s1443_s10 }
 0x237   : > { %v689_v24 = vpack.c.bf16 %v687_v23, %v686_v22 }
 0x238   : > { %p1445_p3 = pnand %p1444_p0, %p2009_p2  ;;  %p1452_p1 = por %p1451_p12, %p1450_p9 }
 0x239   : > { %1224 = vmatmul.mubr.bf16.vlgmr.msra.gmra.mrb[8].mxu0 %v689_v24 }
 0x23a   : > { %p1446_p5 = pneg %p1445_p3 }
 0x23c   : > { %p1453_p13 = pnand %p1452_p1, %p1446_p5 }
 0x30c   : > { %v1225_v27 = vpop.f32.mrb[8].mxu0 }
 0x30d   : > { %v804_v28 = vadd.f32 %v1225_v27, %v1153_v25  ;;  %v795_v29 = vpop.f32.mrb[9].mxu0 }
 0x30e   : > { %v796_v30 = vadd.f32 %v1153_v25, %v795_v29  ;;  %v1226_v31 = vpop.f32.mrb[10].mxu0 }
 0x30f   : > { %814 = vmax.xlane.f32.xlu1 %v804_v28  ;;  %v798_v32 = vpop.f32.mrb[11].mxu0  ;;  %v807_v33 = vadd.f32 %v1226_v31, %v1153_v25 }
 0x310   : > { %810 = vmax.xlane.f32.xlu0 %v796_v30  ;;  %v799_v34 = vadd.f32 %v1153_v25, %v798_v32 }
 0x313   : > { %816 = vmax.xlane.f32.xlu1 %v807_v33 }
 0x314   : > { %812 = vmax.xlane.f32.xlu0 %v799_v34 }
 0x39c   : > { %v815_v35 = vpop.xlane.xlu1 %814 }
 0x39d   : > { %v1805_v36 = vsub.f32 %v804_v28, %v815_v35  ;;  %v811_v37 = vpop.xlane.xlu0 %810 }
 0x39e   : > { %v1807_v38 = vsub.f32 %v796_v30, %v811_v37 }
 0x39f   : > { %v826_v41 = vmul.f32 1.442695, %v1805_v36 }
 0x3a0   : > { %v822_v39 = vmul.f32 1.442695, %v1807_v38  ;;  %v817_v40 = vpop.xlane.xlu1 %816 }
 0x3a1   : > { %v813_v42 = vpop.xlane.xlu0 %812  ;;  %v1811_v43 = vsub.f32 %v807_v33, %v817_v40 }
 0x3a2   : > { %1333 = vpow2.f32 %v822_v39  ;;  %v1813_v44 = vsub.f32 %v799_v34, %v813_v42 }
 0x3a3   : > { %1335 = vpow2.f32 %v826_v41  ;;  %v828_v46 = vmul.f32 1.442695, %v1811_v43 }
 0x3a4   : > { %v824_v45 = vmul.f32 1.442695, %v1813_v44 }
 0x3a6   : > { %1337 = vpow2.f32 %v824_v45 }
 0x3a7   : > { %1339 = vpow2.f32 %v828_v46 }
 0x3ac   : > { %v1817_v47 = vpop.eup %1333 }
 0x3ad   : > { %830 = vadd.xlane.f32.xlu0 %v1817_v47  ;;  %v1820_v48 = vpop.eup %1335 }
 0x3b0   : > { %v1822_v49 = vpop.eup %1337 }
 0x3b1   : > { %834 = vadd.xlane.f32.xlu0 %v1820_v48  ;;  %832 = vadd.xlane.f32.xlu1 %v1822_v49  ;;  %v1826_v50 = vpop.eup %1339 }
 0x3b5   : > { %836 = vadd.xlane.f32.xlu1 %v1826_v50 }
 0x43a   : > { %v1829_v51 = vpop.xlane.xlu0 %830 }
 0x43b   : > { %1341 = vlog2.f32 %v1829_v51 }
 0x43e   : > { %v1832_v52 = vpop.xlane.xlu1 %832  ;;  %v1834_v53 = vpop.xlane.xlu0 %834 }
 0x43f   : > { %1343 = vlog2.f32 %v1832_v52 }
 0x440   : > { %1345 = vlog2.f32 %v1834_v53 }
 0x442   : > { %v1838_v54 = vpop.xlane.xlu1 %836 }
 0x443   : > { %1347 = vlog2.f32 %v1838_v54 }
 0x444   : > { %1349 = vrcp.f32 %v1829_v51 }
 0x445   : > { %v1342_v55 = vpop.eup %1341  ;;  %1351 = vrcp.f32 %v1832_v52 }
 0x446   : > { %v1841_v56 = vmul.f32 0.6931472, %v1342_v55  ;;  %1353 = vrcp.f32 %v1834_v53 }
 0x447   : > { %1355 = vrcp.f32 %v1838_v54 }
 0x448   : > { %v1846_v58 = vsub.f32 %v1807_v38, %v1841_v56 }
 0x449   : > { %v1344_v59 = vpop.eup %1343 }
 0x44a   : > { %v1848_v60 = vmul.f32 0.6931472, %v1344_v59  ;;  %v878_v61 = vadd.f32 %v874_v57, %v1846_v58  ;;  %v1346_v62 = vpop.eup %1345  ;;  %v850_v57 = vmul.f32 %v1817_v47, %v1807_v38  ;;  %v851_v59 = vmul.f32 %v1822_v49, %v1813_v44 }
 0x44b   : > { %v1852_v0 = vmul.f32 0.6931472, %v1346_v62  ;;  %v853_v62 = vmul.f32 %v1826_v50, %v1811_v43 }
 0x44c   : > { %882 = vmax.xlane.f32.xlu0 %v878_v61  ;;  %v1856_v1 = vsub.f32 %v1813_v44, %v1848_v60 }
 0x44d   : > { %v1348_v2 = vpop.eup %1347  ;;  %v1864_v6 = vsub.f32 %v1805_v36, %v1852_v0 }
 0x44e   : > { %v1859_v4 = vmul.f32 0.6931472, %v1348_v2  ;;  %v879_v5 = vadd.f32 %v875_v63, %v1856_v1 }
 0x44f   : > { %v880_v8 = vadd.f32 %v876_v3, %v1864_v6 }
 0x450   : > { %884 = vmax.xlane.f32.xlu1 %v879_v5  ;;  %v1870_v9 = vsub.f32 %v1811_v43, %v1859_v4 }
 0x451   : > { %886 = vmax.xlane.f32.xlu0 %v880_v8 }
 0x452   : > { %v881_v10 = vadd.f32 %v877_v7, %v1870_v9 }
 0x454   : > { %888 = vmax.xlane.f32.xlu1 %v881_v10 }
 0x4d9   : > { %v883_v12 = vpop.xlane.xlu0 %882 }
 0x4da   : > { %vm892_vm1 = vcmp.ge.f32.partialorder %v878_v61, %v883_v12  ;;  %v852_v61 = vmul.f32 %v1820_v48, %v1805_v36 }
 0x4db   : > { %v896_v13 = vsel %vm892_vm1, %v1874_v11, 128 }
 0x4dc   : > { %v901_v14 = vshra.s32 %v896_v13, 16  ;;  %v900_v28 = vand.u32 65535, %v896_v13 }
 0x4dd   : > { %v885_v15 = vpop.xlane.xlu1 %884 }
 0x4de   : > { %vm893_vm2 = vcmp.ge.f32.partialorder %v879_v5, %v885_v15  ;;  %v903_v16 = vcvt.s32.f32 %v901_v14  ;;  %v887_v18 = vpop.xlane.xlu0 %886  ;;  %v902_v31 = vcvt.s32.f32 %v900_v28 }
 0x4df   : > { %v897_v17 = vsel %vm893_vm2, %v1874_v11, 128  ;;  %vm894_vm3 = vcmp.ge.f32.partialorder %v880_v8, %v887_v18 }
 0x4e0   : > { %904 = vmin.xlane.f32.xlu0 %v903_v16  ;;  %v915_v19 = vshra.s32 %v897_v17, 16  ;;  %v898_v20 = vsel %vm894_vm3, %v1874_v11, 128  ;;  %v914_v29 = vand.u32 65535, %v897_v17 }
 0x4e1   : > { %v889_v21 = vpop.xlane.xlu1 %888  ;;  %v929_v22 = vshra.s32 %v898_v20, 16  ;;  %v928_v32 = vand.u32 65535, %v898_v20  ;;  %v1350_v20 = vpop.eup %1349 }
 0x4e2   : > { %vm895_vm4 = vcmp.ge.f32.partialorder %v881_v10, %v889_v21  ;;  %v917_v26 = vcvt.s32.f32 %v915_v19  ;;  %v916_v37 = vcvt.s32.f32 %v914_v29 }
 0x4e3   : > { %v899_v23 = vsel %vm895_vm4, %v1874_v11, 128  ;;  %v931_v24 = vcvt.s32.f32 %v929_v22  ;;  %v930_v41 = vcvt.s32.f32 %v928_v32  ;;  %v1352_v22 = vpop.eup %1351 }
 0x4e4   : > { %918 = vmin.xlane.f32.xlu1 %v917_v26  ;;  %v943_v25 = vshra.s32 %v899_v23, 16  ;;  %v942_v34 = vand.u32 65535, %v899_v23 }
 0x4e5   : > { %932 = vmin.xlane.f32.xlu0 %v931_v24 }
 0x4e6   : > { %v945_v27 = vcvt.s32.f32 %v943_v25  ;;  %v944_v46 = vcvt.s32.f32 %v942_v34 }
 0x4e8   : > { %946 = vmin.xlane.f32.xlu1 %v945_v27 }
 0x56d   : > { %v905_v30 = vpop.xlane.xlu0 %904 }
 0x56e   : > { %vm906_vm5 = vcmp.eq.f32.partialorder %v903_v16, %v905_v30  ;;  %v911_v63 = vcvt.f32.s32 %v905_v30 }
 0x56f   : > { %v907_v33 = vsel %vm906_vm5, %v902_v31, inf }
 0x570   : > { %908 = vmin.xlane.f32.xlu0 %v907_v33  ;;  %v912_v3 = vshll.u32 %v911_v63, 16 }
 0x571   : > { %v919_v35 = vpop.xlane.xlu1 %918 }
 0x572   : > { %vm920_vm6 = vcmp.eq.f32.partialorder %v917_v26, %v919_v35  ;;  %v933_v39 = vpop.xlane.xlu0 %932  ;;  %v925_v5 = vcvt.f32.s32 %v919_v35 }
 0x573   : > { %v921_v40 = vsel %vm920_vm6, %v916_v37, inf  ;;  %vm934_vm7 = vcmp.eq.f32.partialorder %v931_v24, %v933_v39  ;;  %v939_v8 = vcvt.f32.s32 %v933_v39 }
 0x574   : > { %922 = vmin.xlane.f32.xlu1 %v921_v40  ;;  %v935_v42 = vsel %vm934_vm7, %v930_v41, inf  ;;  %v926_v10 = vshll.u32 %v925_v5, 16 }
 0x575   : > { %v947_v45 = vpop.xlane.xlu1 %946  ;;  %936 = vmin.xlane.f32.xlu0 %v935_v42  ;;  %v940_v48 = vshll.u32 %v939_v8, 16 }
 0x576   : > { %vm948_vm8 = vcmp.eq.f32.partialorder %v945_v27, %v947_v45  ;;  %v953_v12 = vcvt.f32.s32 %v947_v45 }
 0x577   : > { %v949_v55 = vsel %vm948_vm8, %v944_v46, inf }
 0x578   : > { %950 = vmin.xlane.f32.xlu1 %v949_v55  ;;  %v954_v14 = vshll.u32 %v953_v12, 16 }
 0x579   : > { %854 = vadd.xlane.f32.xlu0 %v850_v57 }
 0x57c   : > { %856 = vadd.xlane.f32.xlu1 %v851_v59 }
 0x57d   : > { %858 = vadd.xlane.f32.xlu0 %v852_v61 }
 0x580   : > { %860 = vadd.xlane.f32.xlu1 %v853_v62 }
 0x5fd   : > { %v909_v2 = vpop.xlane.xlu0 %908 }
 0x5fe   : > { %v910_v7 = vcvt.f32.s32 %v909_v2 }
 0x600   : > { %v913_v38 = vadd.s32 %v912_v3, %v910_v7 }
 0x601   : > { %v923_v47 = vpop.xlane.xlu1 %922 }
 0x602   : > { %v924_v44 = vcvt.f32.s32 %v923_v47  ;;  %vm956_vm9 = vcmp.eq.s32.totalorder %v1874_v11, %v913_v38  ;;  %v937_v49 = vpop.xlane.xlu0 %936  ;;  %v972_v53 = vcvt.s32.f32 %v913_v38 }
 0x603   : > { %v960_v36 = vsel %vm956_vm9, %v1846_v58, 0.0  ;;  %v938_v43 = vcvt.f32.s32 %v937_v49 }
 0x604   : > { %v927_v13 = vadd.s32 %v926_v10, %v924_v44  ;;  %964 = vadd.xlane.f32.xlu0 %v960_v36 }
 0x605   : > { %v951_v50 = vpop.xlane.xlu1 %950  ;;  %v941_v15 = vadd.s32 %v940_v48, %v938_v43 }
 0x606   : > { %v952_v16 = vcvt.f32.s32 %v951_v50  ;;  %vm957_vm10 = vcmp.eq.s32.totalorder %v1874_v11, %v927_v13  ;;  %v973_v32 = vcvt.s32.f32 %v927_v13 }
 0x607   : > { %v961_v17 = vsel %vm957_vm10, %v1856_v1, 0.0  ;;  %vm958_vm11 = vcmp.eq.s32.totalorder %v1874_v11, %v941_v15  ;;  %v855_v1 = vpop.xlane.xlu0 %854  ;;  %v974_v37 = vcvt.s32.f32 %v941_v15 }
 0x608   : > { %v955_v18 = vadd.s32 %v954_v14, %v952_v16  ;;  %966 = vadd.xlane.f32.xlu1 %v961_v17  ;;  %v962_v19 = vsel %vm958_vm11, %v1864_v6, 0.0  ;;  %v863_v26 = vmul.f32 %v1350_v20, %v855_v1 }
 0x609   : > { %968 = vadd.xlane.f32.xlu0 %v962_v19  ;;  %v857_v21 = vpop.xlane.xlu1 %856 }
 0x60a   : > { %vm959_vm12 = vcmp.eq.s32.totalorder %v1874_v11, %v955_v18  ;;  %v870_v23 = vsub.f32 %v1841_v56, %v863_v26  ;;  %v865_v24 = vmul.f32 %v1352_v22, %v857_v21  ;;  %v975_v41 = vcvt.s32.f32 %v955_v18 }
 0x60b   : > { %v963_v58 = vsel %vm959_vm12, %v1870_v9, 0.0  ;;  %v859_v6 = vpop.xlane.xlu0 %858  ;;  %v1354_v9 = vpop.eup %1353 }
 0x60c   : > { %970 = vadd.xlane.f32.xlu1 %v963_v58  ;;  %v867_v51 = vmul.f32 %v1354_v9, %v859_v6  ;;  %v1356_v52 = vpop.eup %1355  ;;  %v871_v54 = vsub.f32 %v1848_v60, %v865_v24  ;;  %v979_v56 = vsel %vm978_vm13, %v870_v23, 0.0 }
 0x60d   : > { %v861_v25 = vpop.xlane.xlu1 %860 }
 0x60e   : > { %v869_v27 = vmul.f32 %v1356_v52, %v861_v25  ;;  %v872_v30 = vsub.f32 %v1852_v0, %v867_v51  ;;  %v980_v60 = vsel %vm978_vm13, %v871_v54, 0.0 }
 0x610   : > { %v873_v33 = vsub.f32 %v1859_v4, %v869_v27  ;;  %v981_v39 = vsel %vm978_vm13, %v872_v30, 0.0 }
 0x612   : > { %v982_v45 = vsel %vm978_vm13, %v873_v33, 0.0 }
 0x691   : > { %v965_v28 = vpop.xlane.xlu0 %964 }
 0x692   : > { %v983_v29 = vsel %vm977_vm14, %v965_v28, %v979_v56 }
 0x693   : > { %v987_v31 = vsel %vm976_vm15, %v972_v53, %v983_v29 }
 0x694   : > { %991 = vst [vmem:[%s368_s24] sm:$0xff] %v987_v31 }
 0x695   : > { %v967_v34 = vpop.xlane.xlu1 %966 }
 0x696   : > { %v984_v35 = vsel %vm977_vm14, %v967_v34, %v980_v60  ;;  %v969_v40 = vpop.xlane.xlu0 %968 }
 0x697   : > { %v988_v0 = vsel %vm976_vm15, %v973_v32, %v984_v35  ;;  %v985_v4 = vsel %vm977_vm14, %v969_v40, %v981_v39 }
 0x698   : > { %992 = vst [vmem:[%s368_s24 + $0x8] sm:$0xff] %v988_v0  ;;  %v989_v42 = vsel %vm976_vm15, %v974_v37, %v985_v4 }
 0x699   : > { %v971_v46 = vpop.xlane.xlu1 %970  ;;  %993 = vst [vmem:[%s368_s24 + $0x10] sm:$0xff] %v989_v42 }
 0x69a   : > { %v986_v55 = vsel %vm977_vm14, %v971_v46, %v982_v45 }
 0x69b   : > { %v990_v57 = vsel %vm976_vm15, %v975_v41, %v986_v55 }
 0x69c   : > { %994 = vst [vmem:[%s368_s24 + $0x18] sm:$0xff] %v990_v57 }
 0x69d   : > { %1456 = shalt.err (!%p1453_p13)
}
 0x69e   : > { %s1457_s18 = scalar_lea.hbm %s1935_s15, 512  ;;  %s1461_s17 = scalar_lea.hbm %s1991_s8, 1024 }
 0x69f   : > { %p1458_p6 = scmp.ne.s32.totalorder %s1935_s15, %s1457_s18  ;;  %p1462_p7 = scmp.lt.u32.totalorder %s1935_s15, %s1991_s8 }
 0x6a0   : > { %p1463_p8 = scmp.lt.u32.totalorder %s1461_s17, %s1457_s18  ;;  %p1465_p0 = scmp.lt.u32.totalorder %s1457_s18, %s1935_s15 }
 0x6a1   : > { %p1459_p10 = pnand %p1458_p6, %p2009_p2 }
 0x6a2   : > { %p1464_p11 = por %p1463_p8, %p1462_p7 }
 0x6a3   : > { %p1460_p4 = pneg %p1459_p10 }
 0x6a4   : > { %p1466_p3 = por %p1465_p0, %p1464_p11 }
 0x6a6   : > { %p1467_p5 = pnand %p1466_p3, %p1460_p4 }
 0x6a8   : > { %1470 = shalt.err (!%p1467_p5)
}
 0x6a9   : > { %s1524_s10 = smov 128   ;;  %s1525_s20 = smov 8  }
 0x6aa   : > { %1237 = dma.vmem_to_hbm [thread:$0]  (%p2009_p2), %s1924_s14, 512, %s1935_s15, %s996_s13, %s1524_s10, %s1524_s10, %s1525_s20  }
 0x6ab PF: > { %s1024_s23 = sand.u32 1, %s1501_s27   ;;  %p2010_p9 = scmp.ne.s32.totalorder %s1998_s12, 0 }
 0x6ac   : > { %p2011_p12 = scmp.ge.s32.totalorder %s1513_s30, 2  ;;  %s1025_s11 = scalar_lea.sflag [#allocation4], %s1024_s23 }
 0x6ae   : > { %p1251_p1 = pnand %p2011_p12, %p2010_p9 }
 0x6b0   : > { %1496 = dma.done.wait (!%p1251_p1), %s1025_s11, 512  }
 0x6b1   : > { %1498 = vsyncadd (!%p1251_p1), %s1025_s11, 4294966784  ;;  %p22_p13 = scmp.ge.s32.totalorder %s1684_s22, 4   ;;  %s2012_s27 = smov %s1505_s28 }
 0x6b2   : > { %s2013_s28 = smov %s1509_s29  ;;  %s2014_s29 = smov %s1693_s25 }
 0x6b3   : > { %s2015_s30 = smov %s1684_s22  ;;  %24 = sbr.rel (!%p22_p13) target bundleno = 6 (0x6), region = 108 }
 0x6ba   :  { %1030 = vsyncpa [#allocation3], 1 }
 0x6bb   :  { %1032 = vsyncpa [#allocation3 + $0x1], 1 }
 0x6bc   :  { %1033 = vsyncpa [#allocation6], 1 }
 0x6bd   :  { %1034 = vsyncpa [#allocation4], 1 }
 0x6be   :  { %1036 = vsyncpa [#allocation4 + $0x1], 1 }

</bundles_post_ra>
